<compile_context>
chip_gen: v7x
topology: tpu7x:2x2x1
jax: 0.10.0
libtpu: 0.0.40
codegen_flags: <defaults>
</compile_context>

<pallas_src>
import jax
import jax.numpy as jnp
from jax.experimental import pallas as pl
from jax.experimental.pallas import tpu as pltpu

_LANE = 128   # TPU lane width (last dim)
_SUBLANE = 8  # TPU sublane width (second-to-last dim, f32)


def _round_up(x, m):
    return ((x + m - 1) // m) * m


def _pick_tile_r(rp, h, max_tile=2048, weight_buf_budget=8 << 20):
    """Largest power-of-two multiple of 128 (<= max_tile) dividing rp whose
    double-buffered bf16 weight block fits the budget (v7x/v5e scoped-VMEM safe)."""
    best = _LANE
    t = _LANE
    while t <= min(rp, max_tile):
        if rp % t == 0 and 2 * (h * t * 2) <= weight_buf_budget:
            best = t
        t *= 2
    return best


def prepare_pruning_params(weight, bias):
    """One-time (init-time) lane-padding + bf16 cast of hidden2rel parameters.
       weight: [H, R] f32 (x @ W layout), bias: [1, R] f32."""
    H, R = weight.shape
    Rp = _round_up(max(R, _LANE), _LANE)
    w_pad = jnp.pad(weight, ((0, 0), (0, Rp - R))).astype(jnp.bfloat16)
    b_pad = jnp.pad(bias, ((0, 0), (0, Rp - R))).astype(jnp.float32)
    return w_pad, b_pad


def make_pruning_loss_kernel(label_smoothing, num_rels, rels_padded,
                             batch, batch_padded, tile_r):
    ls = float(label_smoothing)
    inv_r = 1.0 / float(num_rels)       # label smoothing uses the REAL relation count
    R = int(num_rels)
    B = int(batch)
    Bp = int(batch_padded)

    mask_cols = int(rels_padded) != R   # trace-time decisions: masks compiled in only
    mask_rows = Bp != B                 # when padding actually exists

    def kernel(cls_ref, w_ref, b_ref, y_ref, loss_ref):
        r = pl.program_id(0)

        # --- hidden2rel on this relation tile: bf16 operands, f32 MXU accumulation.
        z = jnp.dot(cls_ref[...], w_ref[...],
                    preferred_element_type=jnp.float32)          # [Bp, tile_r] f32
        z = z + b_ref[...]                                       # bias broadcasts

        # --- prediction = sigmoid(z) in f32 (saturates exactly like torch.sigmoid),
        #     then BCELoss log terms with PyTorch's -100 clamp.
        p = 1.0 / (1.0 + jnp.exp(-z))
        log_p = jnp.maximum(jnp.log(p), -100.0)
        log_1mp = jnp.maximum(jnp.log(1.0 - p), -100.0)

        # --- label smoothing: (1 - ls) * actual + 1 / actual.size(1)
        actual = (1.0 - ls) * y_ref[...] + inv_r
        bce = -(actual * log_p + (1.0 - actual) * log_1mp)       # [Bp, tile_r]

        # --- zero padded relation columns / batch rows (small iotas, broadcasted).
        if mask_cols:
            col = r * tile_r + jax.lax.broadcasted_iota(jnp.int32, (1, tile_r), 1)
            bce = jnp.where(col < R, bce, 0.0)
        if mask_rows:
            row = jax.lax.broadcasted_iota(jnp.int32, (Bp, 1), 0)
            bce = jnp.where(row < B, bce, 0.0)

        partial = jnp.sum(bce)

        @pl.when(r == 0)
        def _():
            loss_ref[0, 0] = 0.0

        loss_ref[0, 0] += partial

    return kernel


def pruning_model_loss(hidden_states, w_pad, b_pad, rel_one_hot_pad,
                       num_rels, label_smoothing, tile_r=None):
    """hidden_states:   [B, S, H] f32  (stand-in for RoBERTa last hidden states)
       w_pad:           [H, Rp] bf16   (hidden2rel weight, lane-padded at init time)
       b_pad:           [1, Rp] f32
       rel_one_hot_pad: [B, Rp] f32    (one-hot built at padded width; no per-call pad)
       returns scalar f32 loss."""
    B, S, H = hidden_states.shape
    Hw, Rp = w_pad.shape
    assert Hw == H and Rp % _LANE == 0
    assert b_pad.shape == (1, Rp) and rel_one_hot_pad.shape == (B, Rp)

    # CLS token extraction (== hidden.transpose(1,0)[0]) at the XLA level: only
    # B*H values ever cross HBM->VMEM for the activations; bf16 for the MXU.
    cls = hidden_states[:, 0, :].astype(jnp.bfloat16)            # [B, H]

    Bp = _round_up(B, _SUBLANE)
    y = rel_one_hot_pad.astype(jnp.float32)
    if Bp != B:
        # Tiny activation-only pad; weight/bias are never re-padded per call.
        cls = jnp.pad(cls, ((0, Bp - B), (0, 0)))
        y = jnp.pad(y, ((0, Bp - B), (0, 0)))

    if tile_r is None:
        tile_r = _pick_tile_r(Rp, H)
    grid_r = Rp // tile_r

    kernel = make_pruning_loss_kernel(label_smoothing, num_rels, Rp, B, Bp, tile_r)

    cost = pl.CostEstimate(
        flops=2 * Bp * H * Rp,
        transcendentals=3 * Bp * Rp,                 # exp + 2 logs per element
        bytes_accessed=(cls.size * 2 + w_pad.size * 2
                        + b_pad.size * 4 + y.size * 4 + 4),
    )

    loss = pl.pallas_call(
        kernel,
        out_shape=jax.ShapeDtypeStruct((1, 1), jnp.float32),
        grid_spec=pltpu.PrefetchScalarGridSpec(
            num_scalar_prefetch=0,
            grid=(grid_r,),
            in_specs=[
                pl.BlockSpec((Bp, H), lambda r: (0, 0)),        # cls: resident, 1 DMA
                pl.BlockSpec((H, tile_r), lambda r: (0, r)),    # weight: streamed
                pl.BlockSpec((1, tile_r), lambda r: (0, r)),    # bias:   streamed
                pl.BlockSpec((Bp, tile_r), lambda r: (0, r)),   # labels: streamed
            ],
            out_specs=pl.BlockSpec(memory_space=pltpu.SMEM),    # resident scalar acc
        ),
        compiler_params=pltpu.CompilerParams(
            dimension_semantics=("arbitrary",)),                # reduction axis
        cost_estimate=cost,
    )(cls, w_pad, b_pad, y)
    return loss[0, 0]


def _reference_loss(hidden_states, weight, bias, rel_one_hot, ls, matmul_bf16):
    """Pure-JAX reference with PyTorch BCELoss semantics (f32 sigmoid -> log, -100 clamp)."""
    cls = hidden_states[:, 0, :]
    if matmul_bf16:
        z = jnp.dot(cls.astype(jnp.bfloat16), weight.astype(jnp.bfloat16),
                    preferred_element_type=jnp.float32) + bias
    else:
        z = cls @ weight + bias
    pred = jax.nn.sigmoid(z)
    R = rel_one_hot.shape[1]
    actual = (1.0 - ls) * rel_one_hot + 1.0 / R
    log_p = jnp.maximum(jnp.log(pred), -100.0)
    log_1mp = jnp.maximum(jnp.log(1.0 - pred), -100.0)
    return jnp.sum(-(actual * log_p + (1.0 - actual) * log_1mp))


if __name__ == "__main__":
    # Small shapes consistent with the module's forward:
    # batch=8, seq=8, hidden=32 (stands in for roberta_dim=768), num_relations=16.
    B, S, H, R = 8, 8, 32, 16
    LS = 0.1

    key = jax.random.PRNGKey(0)
    k_h, k_w, k_b, k_y = jax.random.split(key, 4)

    hidden_states = jax.random.normal(k_h, (B, S, H), dtype=jnp.float32)

    # Deterministic "xavier-ish" init for hidden2rel (nn.Linear(H, R)).
    scale = (2.0 / (H + R)) ** 0.5
    weight = scale * jax.random.normal(k_w, (H, R), dtype=jnp.float32)
    bias = 0.01 * jax.random.normal(k_b, (1, R), dtype=jnp.float32)

    # One-time parameter prep (padding + bf16 cast) -- not in the per-call path.
    w_pad, b_pad = prepare_pruning_params(weight, bias)
    Rp = w_pad.shape[1]

    # One-hot relation labels, built directly at the lane-padded width so no
    # per-call jnp.pad is needed on the label tensor either.
    labels = jax.random.randint(k_y, (B,), 0, R)
    rel_one_hot_pad = jax.nn.one_hot(labels, Rp, dtype=jnp.float32)

    loss = pruning_model_loss(hidden_states, w_pad, b_pad, rel_one_hot_pad,
                              num_rels=R, label_smoothing=LS)
    loss = jax.block_until_ready(loss)

    rel_one_hot = jax.nn.one_hot(labels, R, dtype=jnp.float32)
    # Tight check against a reference with matching (bf16-operand) matmul numerics.
    ref_bf16 = _reference_loss(hidden_states, weight, bias, rel_one_hot, LS, True)
    # Loose check against the full-f32 PyTorch-equivalent path.
    ref_f32 = _reference_loss(hidden_states, weight, bias, rel_one_hot, LS, False)

    assert jnp.allclose(loss, ref_bf16, rtol=1e-4, atol=1e-4), (loss, ref_bf16)
    assert jnp.allclose(loss, ref_f32, rtol=2e-2, atol=1e-2), (loss, ref_f32)

    print("KERNEL_OK")
</pallas_src>

<mosaic_0001>
module attributes {stable_mosaic.version = 11 : i64} {
  func.func @kernel(%arg0: i32, %arg1: memref<8x32xbf16, #tpu.memory_space<vmem>>, %arg2: memref<32x128xbf16, #tpu.memory_space<vmem>>, %arg3: memref<1x128xf32, #tpu.memory_space<vmem>>, %arg4: memref<8x128xf32, #tpu.memory_space<vmem>>, %arg5: memref<1x1xf32, #tpu.memory_space<smem>>) attributes {dimension_semantics = [#tpu.dimension_semantics<arbitrary>], iteration_bounds = array<i64: 1>, scalar_prefetch = 0 : i64, scratch_operands = 0 : i64, tpu.core_type = #tpu.core_type<tc>, window_params = [{pipeline_mode = #tpu.pipeline_mode<synchronous>, transform_indices = @transform_0, window_bounds = array<i64: 8, 32>}, {transform_indices = @transform_1, window_bounds = array<i64: 32, 128>}, {transform_indices = @transform_2, window_bounds = array<i64: 1, 128>}, {transform_indices = @transform_3, window_bounds = array<i64: 8, 128>}, {transform_indices = @transform_4, window_bounds = array<i64: 1, 1>}]} {
    %c0 = arith.constant 0 : index
    %c0_0 = arith.constant 0 : index
    %0 = vector.load %arg1[%c0, %c0_0] : memref<8x32xbf16, #tpu.memory_space<vmem>>, vector<8x32xbf16>
    %c0_1 = arith.constant 0 : index
    %c0_2 = arith.constant 0 : index
    %1 = vector.load %arg2[%c0_1, %c0_2] : memref<32x128xbf16, #tpu.memory_space<vmem>>, vector<32x128xbf16>
    %cst = arith.constant dense<0.000000e+00> : vector<8x128xf32>
    %2 = tpu.matmul %0, %1, %cst {dimension_numbers = #tpu.dot_dimension_numbers<[1], [0], [0], [1], [0, 0, 1, 1], [], []>} : vector<8x32xbf16>, vector<32x128xbf16>, vector<8x128xf32> -> vector<8x128xf32>
    %c0_3 = arith.constant 0 : index
    %c0_4 = arith.constant 0 : index
    %3 = vector.load %arg3[%c0_3, %c0_4] : memref<1x128xf32, #tpu.memory_space<vmem>>, vector<1x128xf32>
    %4 = vector.broadcast %3 : vector<1x128xf32> to vector<8x128xf32>
    %5 = arith.addf %2, %4 : vector<8x128xf32>
    %cst_5 = arith.constant 0.000000e+00 : f32
    %6 = vector.broadcast %cst_5 : f32 to vector<8x128xf32>
    %7 = arith.subf %6, %5 : vector<8x128xf32>
    %8 = math.exp %7 : vector<8x128xf32>
    %cst_6 = arith.constant 1.000000e+00 : f32
    %9 = vector.broadcast %cst_6 : f32 to vector<8x128xf32>
    %10 = arith.addf %9, %8 : vector<8x128xf32>
    %cst_7 = arith.constant 1.000000e+00 : f32
    %11 = vector.broadcast %cst_7 : f32 to vector<8x128xf32>
    %12 = arith.divf %11, %10 : vector<8x128xf32>
    %13 = math.log %12 : vector<8x128xf32>
    %cst_8 = arith.constant -1.000000e+02 : f32
    %14 = vector.broadcast %cst_8 : f32 to vector<8x128xf32>
    %15 = arith.maximumf %13, %14 : vector<8x128xf32>
    %cst_9 = arith.constant 1.000000e+00 : f32
    %16 = vector.broadcast %cst_9 : f32 to vector<8x128xf32>
    %17 = arith.subf %16, %12 : vector<8x128xf32>
    %18 = math.log %17 : vector<8x128xf32>
    %cst_10 = arith.constant -1.000000e+02 : f32
    %19 = vector.broadcast %cst_10 : f32 to vector<8x128xf32>
    %20 = arith.maximumf %18, %19 : vector<8x128xf32>
    %c0_11 = arith.constant 0 : index
    %c0_12 = arith.constant 0 : index
    %21 = vector.load %arg4[%c0_11, %c0_12] : memref<8x128xf32, #tpu.memory_space<vmem>>, vector<8x128xf32>
    %cst_13 = arith.constant 0.899999976 : f32
    %22 = vector.broadcast %cst_13 : f32 to vector<8x128xf32>
    %23 = arith.mulf %22, %21 : vector<8x128xf32>
    %cst_14 = arith.constant 6.250000e-02 : f32
    %24 = vector.broadcast %cst_14 : f32 to vector<8x128xf32>
    %25 = arith.addf %23, %24 : vector<8x128xf32>
    %26 = arith.mulf %25, %15 : vector<8x128xf32>
    %cst_15 = arith.constant 1.000000e+00 : f32
    %27 = vector.broadcast %cst_15 : f32 to vector<8x128xf32>
    %28 = arith.subf %27, %25 : vector<8x128xf32>
    %29 = arith.mulf %28, %20 : vector<8x128xf32>
    %30 = arith.addf %26, %29 : vector<8x128xf32>
    %cst_16 = arith.constant 0.000000e+00 : f32
    %31 = vector.broadcast %cst_16 : f32 to vector<8x128xf32>
    %32 = arith.subf %31, %30 : vector<8x128xf32>
    %c128_i32 = arith.constant 128 : i32
    %33 = arith.muli %arg0, %c128_i32 : i32
    %34 = tpu.iota {dimensions = array<i32: 1>} : vector<1x128xi32>
    %35 = vector.broadcast %33 : i32 to vector<1x128xi32>
    %36 = arith.addi %35, %34 : vector<1x128xi32>
    %c16_i32 = arith.constant 16 : i32
    %37 = vector.broadcast %c16_i32 : i32 to vector<1x128xi32>
    %38 = arith.cmpi slt, %36, %37 : vector<1x128xi32>
    %cst_17 = arith.constant 0.000000e+00 : f32
    %39 = vector.shape_cast %38 : vector<1x128xi1> to vector<1x128xi1>
    %40 = vector.broadcast %39 : vector<1x128xi1> to vector<8x128xi1>
    %41 = vector.broadcast %cst_17 : f32 to vector<8x128xf32>
    %42 = arith.select %40, %32, %41 : vector<8x128xi1>, vector<8x128xf32>
    %43 = vector.shape_cast %42 : vector<8x128xf32> to vector<1x8x128xf32>
    %cst_18 = arith.constant dense<0.000000e+00> : vector<1xf32>
    %44 = vector.multi_reduction <add>, %43, %cst_18 [1, 2] : vector<1x8x128xf32> to vector<1xf32>
    %45 = vector.shape_cast %44 : vector<1xf32> to vector<1x1x1xf32>
    %46 = vector.extract %45[0, 0, 0] : f32 from vector<1x1x1xf32>
    %c0_i32 = arith.constant 0 : i32
    %47 = arith.cmpi eq, %arg0, %c0_i32 : i32
    %48 = arith.extui %47 : i1 to i32
    %c0_i32_19 = arith.constant 0 : i32
    %49 = arith.cmpi ne, %48, %c0_i32_19 : i32
    scf.if %49 {
      %cst_24 = arith.constant 0.000000e+00 : f32
      %c0_25 = arith.constant 0 : index
      %c0_26 = arith.constant 0 : index
      %53 = memref.load %arg5[%c0_25, %c0_26] : memref<1x1xf32, #tpu.memory_space<smem>>
      memref.store %cst_24, %arg5[%c0_25, %c0_26] : memref<1x1xf32, #tpu.memory_space<smem>>
    } else {
    }
    %c0_20 = arith.constant 0 : index
    %c0_21 = arith.constant 0 : index
    %50 = memref.load %arg5[%c0_20, %c0_21] : memref<1x1xf32, #tpu.memory_space<smem>>
    %51 = arith.addf %50, %46 : f32
    %c0_22 = arith.constant 0 : index
    %c0_23 = arith.constant 0 : index
    %52 = memref.load %arg5[%c0_22, %c0_23] : memref<1x1xf32, #tpu.memory_space<smem>>
    memref.store %51, %arg5[%c0_22, %c0_23] : memref<1x1xf32, #tpu.memory_space<smem>>
    return
  }
  func.func @transform_0(%arg0: i32) -> (i32, i32) {
    %c0_i32 = arith.constant 0 : i32
    %c0_i32_0 = arith.constant 0 : i32
    %c0_i32_1 = arith.constant 0 : i32
    return %c0_i32, %c0_i32_0 : i32, i32
  }
  func.func @transform_1(%arg0: i32) -> (i32, i32) {
    %c0_i32 = arith.constant 0 : i32
    %c0_i32_0 = arith.constant 0 : i32
    return %c0_i32, %arg0 : i32, i32
  }
  func.func @transform_2(%arg0: i32) -> (i32, i32) {
    %c0_i32 = arith.constant 0 : i32
    %c0_i32_0 = arith.constant 0 : i32
    return %c0_i32, %arg0 : i32, i32
  }
  func.func @transform_3(%arg0: i32) -> (i32, i32) {
    %c0_i32 = arith.constant 0 : i32
    %c0_i32_0 = arith.constant 0 : i32
    return %c0_i32, %arg0 : i32, i32
  }
  func.func @transform_4(%arg0: i32) -> (i32, i32) {
    %c0_i32 = arith.constant 0 : i32
    %c0_i32_0 = arith.constant 0 : i32
    %c0_i32_1 = arith.constant 0 : i32
    return %c0_i32, %c0_i32_0 : i32, i32
  }
}

</mosaic_0001>

<bundles_post_ra>
// kernel: tpu_custom_call.1
= control target key start
LH: loop header
LB: loop body
LE: loop exit
PB: predicated region body
PF: predicated region fallthrough
CT: control target
= control target key end

     0   :  { %9 = vsyncpa [#allocation3], 0  ;;  %s353_s0 = inlined_call_operand.hbm [shape: bf16[8,32], index: 0, kind: input, shape index: {}]   ;;  %s354_s1 = inlined_call_operand.hbm [shape: bf16[32,128], index: 1, kind: input, shape index: {}]   ;;  %s355_s2 = inlined_call_operand.vmem [shape: f32[1,128], index: 2, kind: input, shape index: {}]   ;;  %s356_s3 = inlined_call_operand.vmem [shape: f32[8,128], index: 3, kind: input, shape index: {}]   ;;  %s357_s4 = inlined_call_operand.hbm [shape: f32[1,1], index: 4, kind: output, shape index: {}]  }
   0x1   :  { %10 = vsyncpa [#allocation6], 0 }
   0x2   :  { %11 = vsyncpa [#allocation4], 0  ;;  %s272_s15 = smov [#allocation2]   ;;  %s273_s17 = smov [#allocation5]  }
   0x3   :  { %s18_s16 = sshll.u32 %s272_s15, 4  ;;  %s27_s18 = sshll.u32 %s273_s17, 4  ;;  %s19_s16 = int_to_ptr.vmem [resolvable:$true] %s18_s16  ;;  %s304_s18 = int_to_ptr.vmem [resolvable:$true] %s27_s18 }
   0x4   :  { %s212_s21 = scalar_lea.hbm %s353_s0, 64 }
   0x5   :  { %p213_p0 = scmp.ne.s32.totalorder %s353_s0, %s212_s21  ;;  %p216_p1 = scmp.lt.u32.totalorder %s212_s21, %s353_s0 }
   0x7   :  { %p218_p2 = pnand %p216_p1, %p213_p0 }
   0x9   :  { %221 = shalt.err (!%p218_p2)
}
   0xa   :  { %s222_s26 = scalar_lea.vmem %s19_s16, 64  ;;  %p227_p4 = scmp.lt.s32.totalorder %s19_s16, %s19_s16 }
   0xb   :  { %p223_p3 = scmp.ne.s32.totalorder %s19_s16, %s222_s26  ;;  %p228_p5 = scmp.lt.s32.totalorder %s222_s26, %s222_s26 }
   0xd   :  { %p229_p6 = por %p228_p5, %p227_p4 }
   0xf   :  { %p230_p7 = pnand %p229_p6, %p223_p3 }
  0x11   :  { %233 = shalt.err (!%p230_p7)
}
  0x12   :  { %21 = dma.hbm_to_vmem [thread:$0]  %s353_s0, 64, %s19_s16, [#allocation3]  }
  0x13   :  { %s234_s5 = scalar_lea.hbm %s354_s1, 256 }
  0x14   :  { %p235_p8 = scmp.ne.s32.totalorder %s354_s1, %s234_s5  ;;  %p238_p9 = scmp.lt.u32.totalorder %s234_s5, %s354_s1 }
  0x16   :  { %p240_p10 = pnand %p238_p9, %p235_p8 }
  0x18   :  { %243 = shalt.err (!%p240_p10)
}
  0x19   :  { %s244_s10 = scalar_lea.vmem %s304_s18, 256  ;;  %p249_p12 = scmp.lt.s32.totalorder %s304_s18, %s304_s18 }
  0x1a   :  { %p245_p11 = scmp.ne.s32.totalorder %s304_s18, %s244_s10  ;;  %p250_p13 = scmp.lt.s32.totalorder %s244_s10, %s244_s10 }
  0x1c   :  { %p251_p0 = por %p250_p13, %p249_p12 }
  0x1e   :  { %p252_p1 = pnand %p251_p0, %p245_p11 }
  0x20   :  { %255 = shalt.err (!%p252_p1)
}
  0x21   :  { %s274_s0 = smov 64   ;;  %s275_s11 = smov 4  }
  0x22   :  { %33 = dma.hbm_to_vmem [thread:$0]  %s354_s1, 256, %s304_s18, [#allocation6], %s274_s0, %s274_s0, %s275_s11  }
  0x23   :  { %266 = dma.done.wait [#allocation3], 64  }
  0x24   :  { %267 = vsyncadd [#allocation3], 4294967232 }
  0x25   :  { %268 = dma.done.wait [#allocation6], 256  }
  0x26   :  { %269 = vsyncadd [#allocation6], 4294967040  ;;  %v276_v0 = vmov 0.0   ;;  %vm277_vm0 = vmmov 0   ;;  %v202_v1 = vld [vmem:[#allocation5] sm:$0xff]   ;;  %v203_v2 = vld [vmem:[#allocation5 + $0x8] sm:$0xff]   ;;  %v135_v22 = vlaneseq }
  0x27   :  { %184 = vmatprep.subr.bf16.mxu0 %v276_v0  ;;  %188 = vmatprep.mubr.msk.bf16.mxu0 %vm277_vm0, %v276_v0  ;;  %v45_v3 = vld [vmem:[#allocation2] sm:$0xf]  ;;  %vm69_vm1 = vcmask 261120   ;;  %v177_v4 = vld [vmem:[%s355_s2] ss:$0 sm:$0xff]  ;;  %s256_s18 = scalar_lea.hbm %s357_s4, 16 }
  0x28   :  { %185 = vmatpush3.bf16.msra.mxu0 %v202_v1  ;;  %v126_v16 = vld [vmem:[%s356_s3] sm:$0xff]  ;;  %v136_v27 = vand.u32 127, %v135_v22  ;;  %p257_p2 = scmp.ne.s32.totalorder %s357_s4, %s256_s18  ;;  %p260_p3 = scmp.lt.u32.totalorder %s256_s18, %s357_s4 }
  0x29   :  { %186 = vmatprep.subr.bf16.mxu0 %v276_v0  ;;  %v127_v17 = vmul.f32 0.9, %v126_v16 }
  0x2a   :  { %vm139_vm2 = vcmp.lt.s32.totalorder %v136_v27, 16  ;;  %p262_p4 = pnand %p260_p3, %p257_p2 }
  0x2b   :  { %v128_v18 = vadd.f32 0.0625, %v127_v17 }
  0x2c   :  { %187 = vmatpush3.bf16.msra.mxu0 %v203_v2 }
  0x2d   :  { %v130_v25 = vsub.f32 1.0, %v128_v18 }
  0x2f   :  { %189 = vmatmul.mubr.msk.bf16.vlgmr.msra.gmra.mrb[0].mxu0 %vm69_vm1, %v45_v3 }
 0x102   :  { %v107_v5 = vpop.f32.mrb[0].mxu0 }
 0x103   :  { %v108_v6 = vadd.f32 %v177_v4, %v107_v5  ;;  %v190_v7 = vpop.f32.mrb[1].mxu0 }
 0x104   :  { %v110_v8 = vpop.f32.mrb[2].mxu0 }
 0x105   :  { %v113_v9 = vsub.f32 0.0, %v108_v6  ;;  %v191_v10 = vpop.f32.mrb[3].mxu0 }
 0x107   :  { %v114_v11 = vmul.f32 1.442695, %v113_v9 }
 0x109   :  { %204 = vpow2.f32 %v114_v11 }
 0x113   :  { %v205_v12 = vpop.eup %204 }
 0x114   :  { %v116_v13 = vadd.f32 1.0, %v205_v12 }
 0x116   :  { %206 = vrcp.f32 %v116_v13 }
 0x120   :  { %v207_v14 = vpop.eup %206 }
 0x121   :  { %208 = vlog2.f32 %v207_v14  ;;  %v122_v15 = vsub.f32 1.0, %v207_v14 }
 0x123   :  { %210 = vlog2.f32 %v122_v15 }
 0x12b   :  { %v209_v19 = vpop.eup %208 }
 0x12c   :  { %v120_v20 = vmul.f32 0.6931472, %v209_v19 }
 0x12d   :  { %v211_v21 = vpop.eup %210 }
 0x12e   :  { %v121_v23 = vmax.f32 %v120_v20, -100.0  ;;  %v124_v24 = vmul.f32 0.6931472, %v211_v21 }
 0x130   :  { %v125_v26 = vmax.f32 %v124_v24, -100.0  ;;  %v129_v28 = vmul.f32 %v128_v18, %v121_v23 }
 0x132   :  { %v131_v29 = vmul.f32 %v130_v25, %v125_v26 }
 0x134   :  { %v132_v30 = vadd.f32 %v131_v29, %v129_v28 }
 0x136   :  { %v133_v31 = vsub.f32 0.0, %v132_v30 }
 0x138   :  { %v142_v32 = vsel %vm139_vm2, %v133_v31, 0.0 }
 0x139   :  { %143 = vadd.xlane.f32.xlu0 %v142_v32 }
 0x1c6   :  { %v144_v33 = vpop.xlane.xlu0 %143 }
 0x1c7   :  { %v145_v34 = vrot.slane %v144_v33, 4 }
 0x1c9   :  { %v146_v35 = vadd.f32 %v145_v34, %v144_v33 }
 0x1cb   :  { %v147_v36 = vrot.slane %v146_v35, 2 }
 0x1cd   :  { %v148_v37 = vadd.f32 %v147_v36, %v146_v35 }
 0x1cf   :  { %v149_v38 = vrot.slane %v148_v37, 1 }
 0x1d1   :  { %v150_v39 = vadd.f32 %v149_v38, %v148_v37 }
 0x1d3   :  { %192 = vpush %v150_v39 }
 0x204   :  { %s193_s2 = spop %192 }
 0x205   :  { %161 = sst [smem:[#allocation7]] %s193_s2 }
 0x206   :  { %265 = shalt.err (!%p262_p4)
}
 0x207   :  { %s278_s23 = smov [#allocation7]  }
 0x208   :  { %169 = dma.smem_to_hbm %s278_s23, 16, %s357_s4, [#allocation4]  }
 0x209   :  { %270 = dma.done.wait [#allocation4], 16  }
 0x20a   :  { %271 = vsyncadd [#allocation4], 4294967280 }
 0x20b   :  { %173 = sfence }
 0x20c   :  { %174 = vsyncpa [#allocation3], 1 }
 0x20d   :  { %175 = vsyncpa [#allocation6], 1 }
 0x20e   :  { %176 = vsyncpa [#allocation4], 1 }

</bundles_post_ra>
